<compile_context>
chip_gen: v5e
topology: v5e:2x2
jax: 0.10.0
libtpu: 0.0.40
codegen_flags: <defaults>
</compile_context>

<pallas_src>
import functools

import jax
import jax.numpy as jnp
from jax.experimental import pallas as pl
from jax.experimental.pallas import tpu as pltpu


# ----------------------------------------------------------------------------
# Pallas kernels
# ----------------------------------------------------------------------------
def _gemm_t_kernel(w_ref, x_ref, b_ref, o_ref, *, activation):
    """o = act(W @ X + b).  W:(Cout,K)  X:(K,M)  b:(Cout,1)  o:(Cout,M).

    Lane-dense: the output's last (lane) dim is M = B*Ho*Wo."""
    acc = jnp.dot(w_ref[...], x_ref[...], preferred_element_type=jnp.float32)
    acc = acc + b_ref[...]                      # (Cout, 1) broadcasts over lanes
    if activation == "relu":
        acc = jnp.maximum(acc, 0.0)
    elif activation == "sigmoid":
        acc = jax.nn.sigmoid(acc)
    o_ref[...] = acc.astype(o_ref.dtype)


def _pallas_gemm_t(w_t, x_t, b, activation):
    """act(w_t @ x_t + b[:, None]) in a single grid-less Pallas call."""
    Cout, _K = w_t.shape
    M = x_t.shape[1]
    return pl.pallas_call(
        functools.partial(_gemm_t_kernel, activation=activation),
        out_shape=jax.ShapeDtypeStruct((Cout, M), jnp.float32),
        in_specs=[pl.BlockSpec(memory_space=pltpu.MemorySpace.VMEM)
                  for _ in range(3)],
        out_specs=pl.BlockSpec(memory_space=pltpu.MemorySpace.VMEM),
    )(w_t, x_t, b.reshape(Cout, 1))


def _bottleneck_kernel(flat_ref, wenc_ref, benc_ref, wmv_ref, bmv_ref,
                       wdec_ref, bdec_ref, eps_ref,
                       mu_ref, logvar_ref, d0_ref, *, embed_dim):
    """Fused:  latent = relu(flat @ Wenc + benc)
               [mu | logvar] = latent @ [Wmu | Wvar] + [bmu | bvar]   (1 dot)
               z  = eps * exp(0.5*logvar) + mu
               d0 = relu(z @ Wdec + bdec)
    """
    lat = jnp.dot(flat_ref[...], wenc_ref[...],
                  preferred_element_type=jnp.float32) + benc_ref[...]
    lat = jnp.maximum(lat, 0.0)

    mv = jnp.dot(lat, wmv_ref[...],
                 preferred_element_type=jnp.float32) + bmv_ref[...]
    mu = mv[:, :embed_dim]
    logvar = mv[:, embed_dim:]

    z = eps_ref[...] * jnp.exp(0.5 * logvar) + mu

    d0 = jnp.dot(z, wdec_ref[...],
                 preferred_element_type=jnp.float32) + bdec_ref[...]
    d0 = jnp.maximum(d0, 0.0)

    mu_ref[...] = mu
    logvar_ref[...] = logvar
    d0_ref[...] = d0


def pallas_bottleneck(flat, w_enc, b_enc, w_mu, b_mu, w_var, b_var,
                      w_dec, b_dec, eps):
    B = flat.shape[0]
    E = w_mu.shape[1]
    D = w_dec.shape[1]
    w_mv = jnp.concatenate([w_mu, w_var], axis=1)      # (E, 2E)
    b_mv = jnp.concatenate([b_mu, b_var], axis=0)      # (2E,)
    return pl.pallas_call(
        functools.partial(_bottleneck_kernel, embed_dim=E),
        out_shape=(
            jax.ShapeDtypeStruct((B, E), jnp.float32),   # mu
            jax.ShapeDtypeStruct((B, E), jnp.float32),   # logvar
            jax.ShapeDtypeStruct((B, D), jnp.float32),   # decoder fc output
        ),
        in_specs=[pl.BlockSpec(memory_space=pltpu.MemorySpace.VMEM)
                  for _ in range(8)],
        out_specs=tuple(pl.BlockSpec(memory_space=pltpu.MemorySpace.VMEM)
                        for _ in range(3)),
    )(flat, w_enc, b_enc.reshape(1, -1), w_mv, b_mv.reshape(1, -1),
      w_dec, b_dec.reshape(1, -1), eps)


# ----------------------------------------------------------------------------
# Conv via channel-first im2col + lane-dense Pallas GEMM (XLA glue for patches)
# ----------------------------------------------------------------------------
def im2col_cfirst(x_cbhw, ksize, stride, pad):
    """x: (C, B, H, W) -> patches^T of shape (k*k*C, B*Ho*Wo), tap-major rows."""
    C, B, H, W = x_cbhw.shape
    xp = jnp.pad(x_cbhw, ((0, 0), (0, 0), (pad, pad), (pad, pad)))
    Ho = (H + 2 * pad - ksize) // stride + 1
    Wo = (W + 2 * pad - ksize) // stride + 1
    taps = []
    for dh in range(ksize):
        for dw in range(ksize):
            t = xp[:, :, dh:dh + stride * Ho:stride, dw:dw + stride * Wo:stride]
            taps.append(t.reshape(C, B * Ho * Wo))
    return jnp.concatenate(taps, axis=0), (B, Ho, Wo)


def conv2d_cfirst(x_cbhw, w_oihw, b, stride, pad, activation):
    """3x3 conv on channel-first (C,B,H,W); PyTorch OIHW weights."""
    Cout, Cin, kh, kw = w_oihw.shape
    patches_t, (B, Ho, Wo) = im2col_cfirst(x_cbhw, kh, stride, pad)
    # patches^T rows are ordered (dh, dw, cin) -> match with weight reorder.
    w_t = jnp.transpose(w_oihw, (0, 2, 3, 1)).reshape(Cout, kh * kw * Cin)
    y = _pallas_gemm_t(w_t, patches_t, b, activation)   # (Cout, B*Ho*Wo)
    return y.reshape(Cout, B, Ho, Wo)


def upsample2x_cfirst(x_cbhw):
    x = jnp.repeat(x_cbhw, 2, axis=2)
    return jnp.repeat(x, 2, axis=3)


# ----------------------------------------------------------------------------
# Parameter construction (deterministic). Static config is kept OUT of the
# jitted pytree so shapes stay concrete at trace time.
# ----------------------------------------------------------------------------
def init_params(key, in_ch=4, enc_dims=(8, 16), dec_dims=(16, 8),
                embedding_dim=32, spatial=16):
    params = {}
    keys = iter(jax.random.split(key, 64))

    def dense(k, fan_in, fan_out):
        scale = 1.0 / jnp.sqrt(fan_in)
        w = jax.random.uniform(k, (fan_in, fan_out), jnp.float32, -scale, scale)
        b = jnp.zeros((fan_out,), jnp.float32)
        return w, b

    def conv(k, cin, cout, ksz=3):
        fan_in = cin * ksz * ksz
        scale = 1.0 / jnp.sqrt(fan_in)
        w = jax.random.uniform(k, (cout, cin, ksz, ksz), jnp.float32,
                               -scale, scale)
        b = jnp.zeros((cout,), jnp.float32)
        return w, b

    chans = [in_ch] + list(enc_dims)
    params["enc_convs"] = [conv(next(keys), chans[i], chans[i + 1])
                           for i in range(len(enc_dims))]
    final_spatial = spatial // (2 ** len(enc_dims))
    flat = enc_dims[-1] * final_spatial * final_spatial
    params["enc_fc"] = dense(next(keys), flat, embedding_dim)

    params["fc_mu"] = dense(next(keys), embedding_dim, embedding_dim)
    params["fc_var"] = dense(next(keys), embedding_dim, embedding_dim)

    params["dec_fc"] = dense(next(keys), embedding_dim, flat)
    dchans = list(dec_dims) + [in_ch]
    params["dec_convs"] = [conv(next(keys), dchans[i], dchans[i + 1])
                           for i in range(len(dec_dims))]

    config = dict(final_spatial=final_spatial, enc_dims=tuple(enc_dims),
                  dec_dims=tuple(dec_dims), in_ch=in_ch,
                  embedding_dim=embedding_dim)
    return params, config


# ----------------------------------------------------------------------------
# VAE forward
# ----------------------------------------------------------------------------
def vae_forward(params, config, x_nchw, eps_key):
    B = x_nchw.shape[0]
    E = config["embedding_dim"]
    fs = config["final_spatial"]
    dec_c0 = config["dec_dims"][0]

    # ---- encoder (channel-first conv stack) ----
    h = jnp.transpose(x_nchw, (1, 0, 2, 3))              # (C, B, H, W)
    for (w, b) in params["enc_convs"]:
        h = conv2d_cfirst(h, w, b, stride=2, pad=1, activation="relu")
    # flatten per-sample in NCHW (channel-major) order, like PyTorch flatten
    flat = jnp.transpose(h, (1, 0, 2, 3)).reshape(B, -1)

    # ---- fused bottleneck: enc_fc -> fc_mu/fc_var -> reparam -> dec_fc ----
    eps = jax.random.normal(eps_key, (B, E), jnp.float32)   # randn_like stand-in
    mu, logvar, d0 = pallas_bottleneck(
        flat, *params["enc_fc"], *params["fc_mu"], *params["fc_var"],
        *params["dec_fc"], eps)

    # ---- decoder ----
    d = d0.reshape(B, dec_c0, fs, fs)                    # NCHW
    d = jnp.transpose(d, (1, 0, 2, 3))                   # (C, B, h, w)
    n_dec = len(params["dec_convs"])
    for i, (w, b) in enumerate(params["dec_convs"]):
        d = upsample2x_cfirst(d)
        act = "sigmoid" if i == n_dec - 1 else "relu"
        d = conv2d_cfirst(d, w, b, stride=1, pad=1, activation=act)
    recon = jnp.transpose(d, (1, 0, 2, 3))               # back to NCHW

    return recon, x_nchw, mu, logvar


# ----------------------------------------------------------------------------
if __name__ == "__main__":
    key = jax.random.PRNGKey(0)
    k_param, k_x, k_eps = jax.random.split(key, 3)

    B, C, H, W = 2, 4, 16, 16
    x = jax.random.normal(k_x, (B, C, H, W), jnp.float32)

    params, config = init_params(k_param, in_ch=C, enc_dims=(8, 16),
                                 dec_dims=(16, 8), embedding_dim=32, spatial=H)

    fwd = jax.jit(lambda p, xx, kk: vae_forward(p, config, xx, kk))
    recon, x_out, mu, logvar = fwd(params, x, k_eps)
    jax.block_until_ready((recon, x_out, mu, logvar))

    assert recon.shape == (B, C, H, W)
    assert mu.shape == (B, 32) and logvar.shape == (B, 32)
    assert jnp.all(jnp.isfinite(recon)) and jnp.all(jnp.isfinite(mu))
    assert jnp.all(jnp.isfinite(logvar))
    print("KERNEL_OK")
</pallas_src>

<mosaic_0001>
module attributes {stable_mosaic.version = 11 : i64} {
  func.func @_gemm_t_kernel(%arg0: memref<8x36xf32, #tpu.memory_space<vmem>>, %arg1: memref<36x128xf32, #tpu.memory_space<vmem>>, %arg2: memref<8x1xf32, #tpu.memory_space<vmem>>, %arg3: memref<8x128xf32, #tpu.memory_space<vmem>>) attributes {dimension_semantics = [], scalar_prefetch = 0 : i64, scratch_operands = 0 : i64, tpu.core_type = #tpu.core_type<tc>} {
    %c0 = arith.constant 0 : index
    %c0_0 = arith.constant 0 : index
    %0 = vector.load %arg0[%c0, %c0_0] : memref<8x36xf32, #tpu.memory_space<vmem>>, vector<8x36xf32>
    %c0_1 = arith.constant 0 : index
    %c0_2 = arith.constant 0 : index
    %1 = vector.load %arg1[%c0_1, %c0_2] : memref<36x128xf32, #tpu.memory_space<vmem>>, vector<36x128xf32>
    %cst = arith.constant dense<0.000000e+00> : vector<8x128xf32>
    %2 = tpu.matmul %0, %1, %cst {dimension_numbers = #tpu.dot_dimension_numbers<[1], [0], [0], [1], [0, 0, 1, 1], [], []>} : vector<8x36xf32>, vector<36x128xf32>, vector<8x128xf32> -> vector<8x128xf32>
    %c0_3 = arith.constant 0 : index
    %c0_4 = arith.constant 0 : index
    %3 = vector.load %arg2[%c0_3, %c0_4] : memref<8x1xf32, #tpu.memory_space<vmem>>, vector<8x1xf32>
    %4 = vector.broadcast %3 : vector<8x1xf32> to vector<8x128xf32>
    %5 = arith.addf %2, %4 : vector<8x128xf32>
    %cst_5 = arith.constant 0.000000e+00 : f32
    %6 = vector.broadcast %cst_5 : f32 to vector<8x128xf32>
    %7 = arith.maximumf %5, %6 : vector<8x128xf32>
    %c0_6 = arith.constant 0 : index
    %c0_7 = arith.constant 0 : index
    %8 = vector.load %arg3[%c0_6, %c0_7] : memref<8x128xf32, #tpu.memory_space<vmem>>, vector<8x128xf32>
    tpu.vector_store %arg3[%c0_6, %c0_7], %7 {strides = array<i32>} : memref<8x128xf32, #tpu.memory_space<vmem>>, vector<8x128xf32>,
    return
  }
}

module attributes {stable_mosaic.version = 11 : i64} {
  func.func @_gemm_t_kernel(%arg0: memref<16x72xf32, #tpu.memory_space<vmem>>, %arg1: memref<72x32xf32, #tpu.memory_space<vmem>>, %arg2: memref<16x1xf32, #tpu.memory_space<vmem>>, %arg3: memref<16x32xf32, #tpu.memory_space<vmem>>) attributes {dimension_semantics = [], scalar_prefetch = 0 : i64, scratch_operands = 0 : i64, tpu.core_type = #tpu.core_type<tc>} {
    %c0 = arith.constant 0 : index
    %c0_0 = arith.constant 0 : index
    %0 = vector.load %arg0[%c0, %c0_0] : memref<16x72xf32, #tpu.memory_space<vmem>>, vector<16x72xf32>
    %c0_1 = arith.constant 0 : index
    %c0_2 = arith.constant 0 : index
    %1 = vector.load %arg1[%c0_1, %c0_2] : memref<72x32xf32, #tpu.memory_space<vmem>>, vector<72x32xf32>
    %cst = arith.constant dense<0.000000e+00> : vector<16x32xf32>
    %2 = tpu.matmul %0, %1, %cst {dimension_numbers = #tpu.dot_dimension_numbers<[1], [0], [0], [1], [0, 0, 1, 1], [], []>} : vector<16x72xf32>, vector<72x32xf32>, vector<16x32xf32> -> vector<16x32xf32>
    %c0_3 = arith.constant 0 : index
    %c0_4 = arith.constant 0 : index
    %3 = vector.load %arg2[%c0_3, %c0_4] : memref<16x1xf32, #tpu.memory_space<vmem>>, vector<16x1xf32>
    %4 = vector.broadcast %3 : vector<16x1xf32> to vector<16x32xf32>
    %5 = arith.addf %2, %4 : vector<16x32xf32>
    %cst_5 = arith.constant 0.000000e+00 : f32
    %6 = vector.broadcast %cst_5 : f32 to vector<16x32xf32>
    %7 = arith.maximumf %5, %6 : vector<16x32xf32>
    %c0_6 = arith.constant 0 : index
    %c0_7 = arith.constant 0 : index
    %8 = vector.load %arg3[%c0_6, %c0_7] : memref<16x32xf32, #tpu.memory_space<vmem>>, vector<16x32xf32>
    tpu.vector_store %arg3[%c0_6, %c0_7], %7 {strides = array<i32>} : memref<16x32xf32, #tpu.memory_space<vmem>>, vector<16x32xf32>,
    return
  }
}

module attributes {stable_mosaic.version = 11 : i64} {
  func.func @_bottleneck_kernel(%arg0: memref<2x256xf32, #tpu.memory_space<vmem>>, %arg1: memref<256x32xf32, #tpu.memory_space<vmem>>, %arg2: memref<1x32xf32, #tpu.memory_space<vmem>>, %arg3: memref<32x64xf32, #tpu.memory_space<vmem>>, %arg4: memref<1x64xf32, #tpu.memory_space<vmem>>, %arg5: memref<32x256xf32, #tpu.memory_space<vmem>>, %arg6: memref<1x256xf32, #tpu.memory_space<vmem>>, %arg7: memref<2x32xf32, #tpu.memory_space<vmem>>, %arg8: memref<2x32xf32, #tpu.memory_space<vmem>>, %arg9: memref<2x32xf32, #tpu.memory_space<vmem>>, %arg10: memref<2x256xf32, #tpu.memory_space<vmem>>) attributes {dimension_semantics = [], scalar_prefetch = 0 : i64, scratch_operands = 0 : i64, tpu.core_type = #tpu.core_type<tc>} {
    %c0 = arith.constant 0 : index
    %c0_0 = arith.constant 0 : index
    %0 = vector.load %arg0[%c0, %c0_0] : memref<2x256xf32, #tpu.memory_space<vmem>>, vector<2x256xf32>
    %c0_1 = arith.constant 0 : index
    %c0_2 = arith.constant 0 : index
    %1 = vector.load %arg1[%c0_1, %c0_2] : memref<256x32xf32, #tpu.memory_space<vmem>>, vector<256x32xf32>
    %cst = arith.constant dense<0.000000e+00> : vector<2x32xf32>
    %2 = tpu.matmul %0, %1, %cst {dimension_numbers = #tpu.dot_dimension_numbers<[1], [0], [0], [1], [0, 0, 1, 1], [], []>} : vector<2x256xf32>, vector<256x32xf32>, vector<2x32xf32> -> vector<2x32xf32>
    %c0_3 = arith.constant 0 : index
    %c0_4 = arith.constant 0 : index
    %3 = vector.load %arg2[%c0_3, %c0_4] : memref<1x32xf32, #tpu.memory_space<vmem>>, vector<1x32xf32>
    %4 = vector.broadcast %3 : vector<1x32xf32> to vector<2x32xf32>
    %5 = arith.addf %2, %4 : vector<2x32xf32>
    %cst_5 = arith.constant 0.000000e+00 : f32
    %6 = vector.broadcast %cst_5 : f32 to vector<2x32xf32>
    %7 = arith.maximumf %5, %6 : vector<2x32xf32>
    %c0_6 = arith.constant 0 : index
    %c0_7 = arith.constant 0 : index
    %8 = vector.load %arg3[%c0_6, %c0_7] : memref<32x64xf32, #tpu.memory_space<vmem>>, vector<32x64xf32>
    %cst_8 = arith.constant dense<0.000000e+00> : vector<2x64xf32>
    %9 = tpu.matmul %7, %8, %cst_8 {dimension_numbers = #tpu.dot_dimension_numbers<[1], [0], [0], [1], [0, 0, 1, 1], [], []>} : vector<2x32xf32>, vector<32x64xf32>, vector<2x64xf32> -> vector<2x64xf32>
    %c0_9 = arith.constant 0 : index
    %c0_10 = arith.constant 0 : index
    %10 = vector.load %arg4[%c0_9, %c0_10] : memref<1x64xf32, #tpu.memory_space<vmem>>, vector<1x64xf32>
    %11 = vector.broadcast %10 : vector<1x64xf32> to vector<2x64xf32>
    %12 = arith.addf %9, %11 : vector<2x64xf32>
    %13 = vector.extract_strided_slice %12 {offsets = [0, 0], sizes = [2, 32], strides = [1, 1]} : vector<2x64xf32> to vector<2x32xf32>
    %14 = vector.extract_strided_slice %12 {offsets = [0, 32], sizes = [2, 32], strides = [1, 1]} : vector<2x64xf32> to vector<2x32xf32>
    %c0_11 = arith.constant 0 : index
    %c0_12 = arith.constant 0 : index
    %15 = vector.load %arg7[%c0_11, %c0_12] : memref<2x32xf32, #tpu.memory_space<vmem>>, vector<2x32xf32>
    %cst_13 = arith.constant 5.000000e-01 : f32
    %16 = vector.broadcast %cst_13 : f32 to vector<2x32xf32>
    %17 = arith.mulf %16, %14 : vector<2x32xf32>
    %18 = math.exp %17 : vector<2x32xf32>
    %19 = arith.mulf %15, %18 : vector<2x32xf32>
    %20 = arith.addf %19, %13 : vector<2x32xf32>
    %c0_14 = arith.constant 0 : index
    %c0_15 = arith.constant 0 : index
    %21 = vector.load %arg5[%c0_14, %c0_15] : memref<32x256xf32, #tpu.memory_space<vmem>>, vector<32x256xf32>
    %cst_16 = arith.constant dense<0.000000e+00> : vector<2x256xf32>
    %22 = tpu.matmul %20, %21, %cst_16 {dimension_numbers = #tpu.dot_dimension_numbers<[1], [0], [0], [1], [0, 0, 1, 1], [], []>} : vector<2x32xf32>, vector<32x256xf32>, vector<2x256xf32> -> vector<2x256xf32>
    %c0_17 = arith.constant 0 : index
    %c0_18 = arith.constant 0 : index
    %23 = vector.load %arg6[%c0_17, %c0_18] : memref<1x256xf32, #tpu.memory_space<vmem>>, vector<1x256xf32>
    %24 = vector.broadcast %23 : vector<1x256xf32> to vector<2x256xf32>
    %25 = arith.addf %22, %24 : vector<2x256xf32>
    %cst_19 = arith.constant 0.000000e+00 : f32
    %26 = vector.broadcast %cst_19 : f32 to vector<2x256xf32>
    %27 = arith.maximumf %25, %26 : vector<2x256xf32>
    %c0_20 = arith.constant 0 : index
    %c0_21 = arith.constant 0 : index
    %28 = vector.load %arg8[%c0_20, %c0_21] : memref<2x32xf32, #tpu.memory_space<vmem>>, vector<2x32xf32>
    tpu.vector_store %arg8[%c0_20, %c0_21], %13 {strides = array<i32>} : memref<2x32xf32, #tpu.memory_space<vmem>>, vector<2x32xf32>,
    %c0_22 = arith.constant 0 : index
    %c0_23 = arith.constant 0 : index
    %29 = vector.load %arg9[%c0_22, %c0_23] : memref<2x32xf32, #tpu.memory_space<vmem>>, vector<2x32xf32>
    tpu.vector_store %arg9[%c0_22, %c0_23], %14 {strides = array<i32>} : memref<2x32xf32, #tpu.memory_space<vmem>>, vector<2x32xf32>,
    %c0_24 = arith.constant 0 : index
    %c0_25 = arith.constant 0 : index
    %30 = vector.load %arg10[%c0_24, %c0_25] : memref<2x256xf32, #tpu.memory_space<vmem>>, vector<2x256xf32>
    tpu.vector_store %arg10[%c0_24, %c0_25], %27 {strides = array<i32>} : memref<2x256xf32, #tpu.memory_space<vmem>>, vector<2x256xf32>,
    return
  }
}

module attributes {stable_mosaic.version = 11 : i64} {
  func.func @_gemm_t_kernel(%arg0: memref<8x144xf32, #tpu.memory_space<vmem>>, %arg1: memref<144x128xf32, #tpu.memory_space<vmem>>, %arg2: memref<8x1xf32, #tpu.memory_space<vmem>>, %arg3: memref<8x128xf32, #tpu.memory_space<vmem>>) attributes {dimension_semantics = [], scalar_prefetch = 0 : i64, scratch_operands = 0 : i64, tpu.core_type = #tpu.core_type<tc>} {
    %c0 = arith.constant 0 : index
    %c0_0 = arith.constant 0 : index
    %0 = vector.load %arg0[%c0, %c0_0] : memref<8x144xf32, #tpu.memory_space<vmem>>, vector<8x144xf32>
    %c0_1 = arith.constant 0 : index
    %c0_2 = arith.constant 0 : index
    %1 = vector.load %arg1[%c0_1, %c0_2] : memref<144x128xf32, #tpu.memory_space<vmem>>, vector<144x128xf32>
    %cst = arith.constant dense<0.000000e+00> : vector<8x128xf32>
    %2 = tpu.matmul %0, %1, %cst {dimension_numbers = #tpu.dot_dimension_numbers<[1], [0], [0], [1], [0, 0, 1, 1], [], []>} : vector<8x144xf32>, vector<144x128xf32>, vector<8x128xf32> -> vector<8x128xf32>
    %c0_3 = arith.constant 0 : index
    %c0_4 = arith.constant 0 : index
    %3 = vector.load %arg2[%c0_3, %c0_4] : memref<8x1xf32, #tpu.memory_space<vmem>>, vector<8x1xf32>
    %4 = vector.broadcast %3 : vector<8x1xf32> to vector<8x128xf32>
    %5 = arith.addf %2, %4 : vector<8x128xf32>
    %cst_5 = arith.constant 0.000000e+00 : f32
    %6 = vector.broadcast %cst_5 : f32 to vector<8x128xf32>
    %7 = arith.maximumf %5, %6 : vector<8x128xf32>
    %c0_6 = arith.constant 0 : index
    %c0_7 = arith.constant 0 : index
    %8 = vector.load %arg3[%c0_6, %c0_7] : memref<8x128xf32, #tpu.memory_space<vmem>>, vector<8x128xf32>
    tpu.vector_store %arg3[%c0_6, %c0_7], %7 {strides = array<i32>} : memref<8x128xf32, #tpu.memory_space<vmem>>, vector<8x128xf32>,
    return
  }
}

module attributes {stable_mosaic.version = 11 : i64} {
  func.func @_gemm_t_kernel(%arg0: memref<4x72xf32, #tpu.memory_space<vmem>>, %arg1: memref<72x512xf32, #tpu.memory_space<vmem>>, %arg2: memref<4x1xf32, #tpu.memory_space<vmem>>, %arg3: memref<4x512xf32, #tpu.memory_space<vmem>>) attributes {dimension_semantics = [], scalar_prefetch = 0 : i64, scratch_operands = 0 : i64, tpu.core_type = #tpu.core_type<tc>} {
    %c0 = arith.constant 0 : index
    %c0_0 = arith.constant 0 : index
    %0 = vector.load %arg0[%c0, %c0_0] : memref<4x72xf32, #tpu.memory_space<vmem>>, vector<4x72xf32>
    %c0_1 = arith.constant 0 : index
    %c0_2 = arith.constant 0 : index
    %1 = vector.load %arg1[%c0_1, %c0_2] : memref<72x512xf32, #tpu.memory_space<vmem>>, vector<72x512xf32>
    %cst = arith.constant dense<0.000000e+00> : vector<4x512xf32>
    %2 = tpu.matmul %0, %1, %cst {dimension_numbers = #tpu.dot_dimension_numbers<[1], [0], [0], [1], [0, 0, 1, 1], [], []>} : vector<4x72xf32>, vector<72x512xf32>, vector<4x512xf32> -> vector<4x512xf32>
    %c0_3 = arith.constant 0 : index
    %c0_4 = arith.constant 0 : index
    %3 = vector.load %arg2[%c0_3, %c0_4] : memref<4x1xf32, #tpu.memory_space<vmem>>, vector<4x1xf32>
    %4 = vector.broadcast %3 : vector<4x1xf32> to vector<4x512xf32>
    %5 = arith.addf %2, %4 : vector<4x512xf32>
    %6 = arith.negf %5 : vector<4x512xf32>
    %7 = math.exp %6 : vector<4x512xf32>
    %cst_5 = arith.constant 1.000000e+00 : f32
    %8 = vector.broadcast %cst_5 : f32 to vector<4x512xf32>
    %9 = arith.addf %8, %7 : vector<4x512xf32>
    %10 = arith.divf %8, %9 : vector<4x512xf32>
    %c0_6 = arith.constant 0 : index
    %c0_7 = arith.constant 0 : index
    %11 = vector.load %arg3[%c0_6, %c0_7] : memref<4x512xf32, #tpu.memory_space<vmem>>, vector<4x512xf32>
    tpu.vector_store %arg3[%c0_6, %c0_7], %10 {strides = array<i32>} : memref<4x512xf32, #tpu.memory_space<vmem>>, vector<4x512xf32>,
    return
  }
}

</mosaic_0001>

<bundles_post_ra>
// kernel: _lambda_.6
= control target key start
LH: loop header
LB: loop body
LE: loop exit
PB: predicated region body
PF: predicated region fallthrough
CT: control target
= control target key end

     0   :  { %v89_v2 = vmov 0   ;;  %vm37_vm0 = vcmask 588800   ;;  %vm69_vm1 = vcmask 261120   ;;  %s155_s1 = inlined_call_operand.vmem [shape: f32[72,32], index: 1, kind: input, shape index: {}]   ;;  %s156_s2 = inlined_call_operand.vmem [shape: f32[16,1], index: 2, kind: input, shape index: {}]   ;;  %s157_s0 = inlined_call_operand.vmem [shape: f32[16,72], index: 0, kind: input, shape index: {}]   ;;  %s158_s3 = inlined_call_operand.vmem [shape: f32[16,32], index: 3, kind: output, shape index: {}]  }
   0x1   :  { %v24_v0 = vld [vmem:[%s155_s1 + $0x40] sm:$0xff]  ;;  %v23_v1 = vld [vmem:[%s155_s1 + $0x38] sm:$0xff]  ;;  %88 = vset.pattern.permute.xlu0 %v89_v2  ;;  %v22_v3 = vld [vmem:[%s155_s1 + $0x30] sm:$0xff] }
   0x2   :  { %51 = vmatpush.msra.mxu0 %v24_v0  ;;  %78 = vmatpush.msra.mxu1 %v24_v0  ;;  %v25_v4 = vld [vmem:[%s156_s2] sm:$0xff]  ;;  %v21_v5 = vld [vmem:[%s155_s1 + $0x28] sm:$0xff]  ;;  %v19_v7 = vld [vmem:[%s155_s1 + $0x18] sm:$0xff] }
   0x3   :  { %29 = vperm.xlu0 %88, %v25_v4   ;;  %v20_v6 = vld [vmem:[%s155_s1 + $0x20] sm:$0xff]  ;;  %v26_v8 = vld [vmem:[%s156_s2 + $0x8] sm:$0xff]  ;;  %v18_v9 = vld [vmem:[%s155_s1 + $0x10] sm:$0xff] }
   0x4   :  { %52 = vmatpush.msra.mxu0 %v23_v1  ;;  %79 = vmatpush.msra.mxu1 %v23_v1  ;;  %v17_v10 = vld [vmem:[%s155_s1 + $0x8] sm:$0xff]  ;;  %v16_v11 = vld [vmem:[%s155_s1] sm:$0xff] }
   0x5   :  { %v14_v12 = vld [vmem:[%s157_s0] sm:$0xff]  ;;  %v15_v13 = vld [vmem:[%s157_s0 + $0x8] sm:$0xff] }
   0x6   :  { %53 = vmatpush.msra.mxu0 %v22_v3  ;;  %80 = vmatpush.msra.mxu1 %v22_v3 }
   0x8   :  { %54 = vmatpush.msra.mxu0 %v21_v5  ;;  %81 = vmatpush.msra.mxu1 %v21_v5 }
   0xa   :  { %55 = vmatpush.msra.mxu0 %v20_v6  ;;  %82 = vmatpush.msra.mxu1 %v20_v6 }
   0xb   :  { %34 = vperm.xlu0 %88, %v26_v8  }
   0xc   :  { %56 = vmatpush.msra.mxu0 %v19_v7  ;;  %83 = vmatpush.msra.mxu1 %v19_v7 }
   0xe   :  { %57 = vmatpush.msra.mxu0 %v18_v9  ;;  %84 = vmatpush.msra.mxu1 %v18_v9 }
  0x10   :  { %58 = vmatpush.msra.mxu0 %v17_v10  ;;  %85 = vmatpush.msra.mxu1 %v17_v10 }
  0x12   :  { %59 = vmatpush.msra.mxu0 %v16_v11  ;;  %86 = vmatpush.msra.mxu1 %v16_v11 }
  0x13   :  { %76 = vmatmul.msk.f32.vlgmr.msra.gmra.mxu0 %vm37_vm0, %v14_v12  ;;  %77 = vmatmul.msk.f32.vlgmr.msra.gmra.mxu1 %vm37_vm0, %v15_v13 }
  0x75   :  { %v30_v14 = vpop.permute.xlu0 %29 }
  0x7d   :  { %v35_v15 = vpop.permute.xlu0 %34 }
  0x90   :  { %v61_v16 = vpop.f32.mrf.mxu0  ;;  %v64_v17 = vpop.f32.mrf.mxu1 }
  0x91   :  { %v62_v18 = vadd.f32 %v61_v16, %v30_v14  ;;  %v65_v19 = vadd.f32 %v64_v17, %v35_v15 }
  0x93   :  { %v67_v20 = vmax.f32 %v62_v18, 0.0  ;;  %v68_v21 = vmax.f32 %v65_v19, 0.0 }
  0x95   :  { %70 = vst.msk [vmem:[%s158_s3] sm:$0xff] %vm69_vm1, %v67_v20 }
  0x96   :  { %71 = vst.msk [vmem:[%s158_s3 + $0x8] sm:$0xff] %vm69_vm1, %v68_v21 }

// kernel: _lambda_.5
= control target key start
LH: loop header
LB: loop body
LE: loop exit
PB: predicated region body
PF: predicated region fallthrough
CT: control target
= control target key end

     0   :  { %vm30_vm0 = vcmask 1043456   ;;  %v64_v2 = vmov 0   ;;  %vm26_vm1 = vcmask 293888   ;;  %s109_s1 = inlined_call_operand.vmem [shape: f32[36,128], index: 1, kind: input, shape index: {}]   ;;  %s110_s2 = inlined_call_operand.vmem [shape: f32[8,1], index: 2, kind: input, shape index: {}]   ;;  %s111_s0 = inlined_call_operand.vmem [shape: f32[8,36], index: 0, kind: input, shape index: {}]   ;;  %s112_s3 = inlined_call_operand.vmem [shape: f32[8,128], index: 3, kind: output, shape index: {}]  }
   0x1   :  { %v19_v0 = vld [vmem:[%s109_s1 + $0x20] sm:$0xf]  ;;  %v18_v1 = vld [vmem:[%s109_s1 + $0x18] sm:$0xff]  ;;  %63 = vset.pattern.permute.xlu0 %v64_v2  ;;  %v17_v3 = vld [vmem:[%s109_s1 + $0x10] sm:$0xff] }
   0x2   :  { %60 = vmatpush.msk.msra.mxu0 %vm30_vm0, %v19_v0  ;;  %v20_v4 = vld [vmem:[%s110_s2] sm:$0xff]  ;;  %v16_v5 = vld [vmem:[%s109_s1 + $0x8] sm:$0xff] }
   0x3   :  { %23 = vperm.xlu0 %63, %v20_v4   ;;  %v15_v6 = vld [vmem:[%s109_s1] sm:$0xff] }
   0x4   :  { %46 = vmatpush.msra.mxu0 %v18_v1  ;;  %v14_v7 = vld [vmem:[%s111_s0] sm:$0xff] }
   0x6   :  { %47 = vmatpush.msra.mxu0 %v17_v3 }
   0x8   :  { %48 = vmatpush.msra.mxu0 %v16_v5 }
   0xa   :  { %49 = vmatpush.msra.mxu0 %v15_v6 }
   0xb   :  { %61 = vmatmul.msk.f32.vlgmr.msra.gmra.mxu0 %vm26_vm1, %v14_v7 }
  0x75   :  { %v24_v8 = vpop.permute.xlu0 %23 }
  0x88   :  { %v51_v9 = vpop.f32.mrf.mxu0 }
  0x89   :  { %v52_v10 = vadd.f32 %v51_v9, %v24_v8 }
  0x8b   :  { %v54_v11 = vmax.f32 %v52_v10, 0.0 }
  0x8d   :  { %55 = vst [vmem:[%s112_s3] sm:$0xff] %v54_v11 }

// kernel: _lambda_.7
= control target key start
LH: loop header
LB: loop body
LE: loop exit
PB: predicated region body
PF: predicated region fallthrough
CT: control target
= control target key end

     0   :  { %16 = vsyncpa [#allocation3], 0  ;;  %s550_s0 = inlined_call_operand.vmem [shape: f32[2,256], index: 0, kind: input, shape index: {}]   ;;  %s551_s1 = inlined_call_operand.vmem [shape: f32[256,32], index: 1, kind: input, shape index: {}]   ;;  %s552_s2 = inlined_call_operand.vmem [shape: f32[1,32], index: 2, kind: input, shape index: {}]   ;;  %s553_s3 = inlined_call_operand.vmem [shape: f32[32,64], index: 3, kind: input, shape index: {}]   ;;  %s554_s4 = inlined_call_operand.vmem [shape: f32[1,64], index: 4, kind: input, shape index: {}]   ;;  %s555_s5 = inlined_call_operand.vmem [shape: f32[32,256], index: 5, kind: input, shape index: {}]   ;;  %s556_s6 = inlined_call_operand.vmem [shape: f32[1,256], index: 6, kind: input, shape index: {}]   ;;  %s557_s7 = inlined_call_operand.vmem [shape: f32[2,32], index: 7, kind: input, shape index: {}]   ;;  %s558_s8 = inlined_call_operand.hbm [shape: f32[2,32], index: 8, kind: output, shape index: {0}]   ;;  %s559_s9 = inlined_call_operand.hbm [shape: f32[2,32], index: 9, kind: output, shape index: {1}]   ;;  %s560_s10 = inlined_call_operand.vmem [shape: f32[2,256], index: 10, kind: output, shape index: {2}]  }
   0x1   :  { %v50_v0 = vld [vmem:[%s551_s1 + $0x78] sm:$0xff]  ;;  %v49_v1 = vld [vmem:[%s551_s1 + $0x70] sm:$0xff]  ;;  %v48_v4 = vld [vmem:[%s551_s1 + $0x68] sm:$0xff] }
   0x2   :  { %v66_v2 = vld [vmem:[%s551_s1 + $0xf8] sm:$0xff]  ;;  %77 = vmatpush.msra.mxu0 %v50_v0  ;;  %v65_v3 = vld [vmem:[%s551_s1 + $0xf0] sm:$0xff]  ;;  %v64_v5 = vld [vmem:[%s551_s1 + $0xe8] sm:$0xff] }
   0x3   :  { %97 = vmatpush.msra.mxu1 %v66_v2  ;;  %v47_v6 = vld [vmem:[%s551_s1 + $0x60] sm:$0xff]  ;;  %v46_v8 = vld [vmem:[%s551_s1 + $0x58] sm:$0xff]  ;;  %v45_v10 = vld [vmem:[%s551_s1 + $0x50] sm:$0xff] }
   0x4   :  { %78 = vmatpush.msra.mxu0 %v49_v1  ;;  %v63_v7 = vld [vmem:[%s551_s1 + $0xe0] sm:$0xff]  ;;  %v62_v9 = vld [vmem:[%s551_s1 + $0xd8] sm:$0xff]  ;;  %v61_v11 = vld [vmem:[%s551_s1 + $0xd0] sm:$0xff] }
   0x5   :  { %98 = vmatpush.msra.mxu1 %v65_v3  ;;  %v44_v12 = vld [vmem:[%s551_s1 + $0x48] sm:$0xff]  ;;  %v34_v14 = vld [vmem:[%s550_s0] sm:$0xf] }
   0x6   :  { %79 = vmatpush.msra.mxu0 %v48_v4  ;;  %v60_v13 = vld [vmem:[%s551_s1 + $0xc8] sm:$0xff]  ;;  %v43_v15 = vld [vmem:[%s551_s1 + $0x40] sm:$0xff]  ;;  %72 = vst [vmem:[#allocation1] ss:$4 sm:$0xff] %v34_v14 }
   0x7   :  { %99 = vmatpush.msra.mxu1 %v64_v5  ;;  %v59_v16 = vld [vmem:[%s551_s1 + $0xc0] sm:$0xff] }
   0x8   :  { %80 = vmatpush.msra.mxu0 %v47_v6 }
   0x9   :  { %100 = vmatpush.msra.mxu1 %v63_v7 }
   0xa   :  { %81 = vmatpush.msra.mxu0 %v46_v8 }
   0xb   :  { %101 = vmatpush.msra.mxu1 %v62_v9 }
   0xc   :  { %82 = vmatpush.msra.mxu0 %v45_v10 }
   0xd   :  { %102 = vmatpush.msra.mxu1 %v61_v11 }
   0xe   :  { %17 = vsyncpa [#allocation5], 0  ;;  %83 = vmatpush.msra.mxu0 %v44_v12  ;;  %v42_v17 = vld [vmem:[%s551_s1 + $0x38] sm:$0xff]  ;;  %v41_v19 = vld [vmem:[%s551_s1 + $0x30] sm:$0xff]  ;;  %vm126_vm0 = vcmask 261120   ;;  %vm219_vm1 = vcmask 254976  }
   0xf   :  { %103 = vmatpush.msra.mxu1 %v60_v13  ;;  %v58_v18 = vld [vmem:[%s551_s1 + $0xb8] sm:$0xff]  ;;  %v57_v20 = vld [vmem:[%s551_s1 + $0xb0] sm:$0xff]  ;;  %v40_v21 = vld [vmem:[%s551_s1 + $0x28] sm:$0xff]  ;;  %s331_s13 = smov 96   ;;  %s332_s22 = smov [#allocation2]   ;;  %vm229_vm2 = vcmask 1041408  }
  0x10   :  { %84 = vmatpush.msra.mxu0 %v43_v15  ;;  %v56_v22 = vld [vmem:[%s551_s1 + $0xa8] sm:$0xff]  ;;  %v39_v23 = vld [vmem:[%s551_s1 + $0x20] sm:$0xff]  ;;  %v38_v25 = vld [vmem:[%s551_s1 + $0x18] sm:$0xff]  ;;  %s238_s23 = sshll.u32 %s332_s22, 4  ;;  %s240_s25 = sshll.u32 %s558_s8, 4  ;;  %s239_s23 = int_to_ptr.vmem [resolvable:$true] %s238_s23  ;;  %s241_s25 = int_to_ptr.hbm [resolvable:$true] %s240_s25 }
  0x11   :  { %104 = vmatpush.msra.mxu1 %v59_v16  ;;  %v55_v24 = vld [vmem:[%s551_s1 + $0xa0] sm:$0xff]  ;;  %v54_v26 = vld [vmem:[%s551_s1 + $0x98] sm:$0xff]  ;;  %v37_v27 = vld [vmem:[%s551_s1 + $0x10] sm:$0xff]  ;;  %s251_s29 = sshll.u32 %s559_s9, 4  ;;  %s252_s29 = int_to_ptr.hbm [resolvable:$true] %s251_s29 }
  0x12   :  { %85 = vmatpush.msra.mxu0 %v42_v17  ;;  %v53_v28 = vld [vmem:[%s551_s1 + $0x90] sm:$0xff]  ;;  %v36_v29 = vld [vmem:[%s551_s1 + $0x8] sm:$0xff]  ;;  %v35_v31 = vld [vmem:[%s551_s1] sm:$0xff] }
  0x13   :  { %105 = vmatpush.msra.mxu1 %v58_v18  ;;  %v52_v30 = vld [vmem:[%s551_s1 + $0x88] sm:$0xff]  ;;  %v51_v32 = vld [vmem:[%s551_s1 + $0x80] sm:$0xff]  ;;  %v121_v35 = vld [vmem:[%s553_s3 + $0x18] sm:$0xff] }
  0x14   :  { %86 = vmatpush.msra.mxu0 %v41_v19  ;;  %v73_v33 = vld.sshfl [vmem:[#allocation1] sm:$0xff pattern:$0x73625140]  ;;  %v74_v34 = vld.sshfl [vmem:[#allocation1 + $0x8] sm:$0xff pattern:$0x73625140]  ;;  %142 = vmatpush.msra.mxu2 %v121_v35 }
  0x15   :  { %106 = vmatpush.msra.mxu1 %v57_v20  ;;  %v120_v36 = vld [vmem:[%s553_s3 + $0x10] sm:$0xff]  ;;  %v119_v37 = vld [vmem:[%s553_s3 + $0x8] sm:$0xff]  ;;  %v118_v38 = vld [vmem:[%s553_s3] sm:$0xff] }
  0x16   :  { %87 = vmatpush.msra.mxu0 %v40_v21  ;;  %143 = vmatpush.msra.mxu2 %v120_v36  ;;  %v275_v39 = vld [vmem:[%s552_s2] ss:$0 sm:$0xff]  ;;  %v167_v45 = vld [vmem:[%s555_s5 + $0x38] sm:$0xff]  ;;  %v166_v46 = vld [vmem:[%s555_s5 + $0x30] sm:$0xff] }
  0x17   :  { %107 = vmatpush.msra.mxu1 %v56_v22  ;;  %v165_v47 = vld [vmem:[%s555_s5 + $0x28] sm:$0xff]  ;;  %189 = vmatpush.msra.mxu3 %v166_v46  ;;  %v164_v48 = vld [vmem:[%s555_s5 + $0x20] sm:$0xff]  ;;  %v163_v55 = vld [vmem:[%s555_s5 + $0x18] sm:$0xff] }
  0x18   :  { %88 = vmatpush.msra.mxu0 %v39_v23  ;;  %144 = vmatpush.msra.mxu2 %v119_v37  ;;  %v276_v49 = vld [vmem:[%s554_s4] ss:$0 sm:$0xff]  ;;  %v162_v56 = vld [vmem:[%s555_s5 + $0x10] sm:$0xff]  ;;  %v161_v57 = vld [vmem:[%s555_s5 + $0x8] sm:$0xff] }
  0x19   :  { %108 = vmatpush.msra.mxu1 %v55_v24  ;;  %190 = vmatpush.msra.mxu3 %v164_v48  ;;  %v160_v58 = vld [vmem:[%s555_s5] sm:$0xff] }
  0x1a   :  { %89 = vmatpush.msra.mxu0 %v38_v25  ;;  %145 = vmatpush.msra.mxu2 %v118_v38  ;;  %v150_v59 = vld [vmem:[%s557_s7] sm:$0x3]  ;;  %s333_s7 = smov [#allocation4]  }
  0x1b   :  { %109 = vmatpush.msra.mxu1 %v54_v26  ;;  %191 = vmatpush.msra.mxu3 %v162_v56  ;;  %s249_s26 = sshll.u32 %s333_s7, 4  ;;  %v168_v0 = vld [vmem:[%s556_s6] sm:$0x3]  ;;  %s250_s26 = int_to_ptr.vmem [resolvable:$true] %s249_s26 }
  0x1c   :  { %90 = vmatpush.msra.mxu0 %v37_v27  ;;  %209 = vmatpush.msrb.mxu2 %v167_v45  ;;  %v170_v1 = vperm.slane %v168_v0, 0  ;;  %v171_v2 = vperm.slane %v168_v0, 1 }
  0x1d   :  { %110 = vmatpush.msra.mxu1 %v53_v28  ;;  %192 = vmatpush.msra.mxu3 %v160_v58 }
  0x1e   :  { %91 = vmatpush.msra.mxu0 %v36_v29  ;;  %210 = vmatpush.msrb.mxu2 %v165_v47 }
  0x1f   :  { %111 = vmatpush.msra.mxu1 %v52_v30 }
  0x20   :  { %92 = vmatpush.msra.mxu0 %v35_v31  ;;  %211 = vmatpush.msrb.mxu2 %v163_v55 }
  0x21   :  { %112 = vmatpush.msra.mxu1 %v51_v32  ;;  %93 = vmatmul.f32.vlgmr.msra.gmra.mxu0 %v73_v33 }
  0x22   :  { %113 = vmatmul.f32.vlgmr.msra.gmra.mxu1 %v74_v34  ;;  %212 = vmatpush.msrb.mxu2 %v161_v57 }
  0x9e   :  { %v94_v40 = vpop.f32.mrf.mxu0 }
  0x9f   :  { %v114_v41 = vpop.f32.mrf.mxu1  ;;  %v95_v42 = vadd.f32 %v275_v39, %v94_v40 }
  0xa1   :  { %v115_v43 = vadd.f32 %v114_v41, %v95_v42 }
  0xa3   :  { %v117_v44 = vmax.f32 %v115_v43, 0.0 }
  0xa5   :  { %269 = vmatmul.msk.f32.vlgmr.msra.gmra.mxu2 %vm126_vm0, %v117_v44 }
 0x128   :  { %v147_v50 = vpop.f32.mrf.mxu2 }
 0x129   :  { %v148_v51 = vadd.f32 %v276_v49, %v147_v50 }
 0x12b   :  { %v151_v52 = vmul.f32 0.5, %v148_v51  ;;  %220 = vst.msk [vmem:[#allocation2] sm:$0x3] %vm219_vm1, %v148_v51 }
 0x12c   :  { %243 = dma.vmem_to_hbm [thread:$0]  %s239_s23, 32, %s241_s25, [#allocation3]  }
 0x12d   :  { %v152_v53 = vmul.f32 1.442695, %v151_v52 }
 0x12f   :  { %277 = vpow2.f32 %v152_v53 }
 0x135   :  { %v278_v54 = vpop.eup %277 }
 0x136   :  { %155 = vrot.lane.b32.xlu0 %v278_v54, %s331_s13 }
 0x13e   :  { %222 = vrot.lane.b32.xlu0 %v148_v51, %s331_s13 }
 0x1a8   :  { %v156_v60 = vpop.permute.xlu0 %155 }
 0x1a9   :  { %v158_v61 = vmul.f32 %v156_v60, %v150_v59 }
 0x1ab   :  { %v159_v62 = vadd.f32 %v158_v61, %v148_v51 }
 0x1ad   :  { %270 = vmatmul.msk.f32.vlgmr.msra.gmra.mxu3 %vm126_vm0, %v159_v62  ;;  %271 = vmatmul.msk.f32.vlgmr.msrb.gmra.mxu2 %vm126_vm0, %v159_v62 }
 0x1b0   :  { %v223_v63 = vpop.permute.xlu0 %222 }
 0x1b1   :  { %225 = vst.msk [vmem:[#allocation4] sm:$0x3] %vm219_vm1, %v223_v63 }
 0x1b2   :  { %254 = dma.vmem_to_hbm [thread:$0]  %s250_s26, 32, %s252_s29, [#allocation5]  }
 0x230   :  { %v194_v3 = vpop.f32.mrf.mxu3  ;;  %v214_v4 = vpop.f32.mrf.mxu2 }
 0x231   :  { %v195_v5 = vadd.f32 %v194_v3, %v170_v1  ;;  %v215_v6 = vadd.f32 %v214_v4, %v171_v2 }
 0x233   :  { %v218_v7 = vmax.f32 %v215_v6, 0.0  ;;  %v217_v8 = vmax.f32 %v195_v5, 0.0 }
 0x235   :  { %v228_v9 = vrot.slane %v218_v7, 6 }
 0x237   :  { %v230_v10 = vsel %vm229_vm2, %v217_v8, %v228_v9 }
 0x238   :  { %232 = vst [vmem:[%s560_s10] sm:$0xf] %v230_v10 }
 0x239   :  { %327 = dma.done.wait [#allocation3], 32  }
 0x23a   :  { %328 = vsyncadd [#allocation3], 4294967264 }
 0x23b   :  { %329 = dma.done.wait [#allocation5], 32  }
 0x23c   :  { %330 = vsyncadd [#allocation5], 4294967264 }
 0x23d   :  { %267 = vsyncpa [#allocation3], 1 }
 0x23e   :  { %268 = vsyncpa [#allocation5], 1 }

// kernel: _lambda_.8
= control target key start
LH: loop header
LB: loop body
LE: loop exit
PB: predicated region body
PF: predicated region fallthrough
CT: control target
= control target key end

     0   :  { %v93_v2 = vmov 0   ;;  %vm40_vm0 = vcmask 130048   ;;  %s180_s1 = inlined_call_operand.vmem [shape: f32[144,128], index: 1, kind: input, shape index: {}]   ;;  %s181_s2 = inlined_call_operand.vmem [shape: f32[8,1], index: 2, kind: input, shape index: {}]   ;;  %s182_s0 = inlined_call_operand.vmem [shape: f32[8,144], index: 0, kind: input, shape index: {}]   ;;  %s183_s3 = inlined_call_operand.vmem [shape: f32[8,128], index: 3, kind: output, shape index: {}]  }
   0x1   :  { %v31_v0 = vld [vmem:[%s180_s1 + $0x78] sm:$0xff]  ;;  %v30_v1 = vld [vmem:[%s180_s1 + $0x70] sm:$0xff]  ;;  %92 = vset.pattern.permute.xlu0 %v93_v2  ;;  %v29_v3 = vld [vmem:[%s180_s1 + $0x68] sm:$0xff] }
   0x2   :  { %44 = vmatpush.msra.mxu0 %v31_v0  ;;  %v28_v4 = vld [vmem:[%s180_s1 + $0x60] sm:$0xff]  ;;  %v27_v5 = vld [vmem:[%s180_s1 + $0x58] sm:$0xff]  ;;  %v33_v6 = vld [vmem:[%s180_s1 + $0x88] sm:$0xff] }
   0x3   :  { %78 = vmatpush.msra.mxu1 %v33_v6  ;;  %v32_v7 = vld [vmem:[%s180_s1 + $0x80] sm:$0xff]  ;;  %v15_v8 = vld [vmem:[%s182_s0 + $0x8] sm:$0xff]  ;;  %v26_v10 = vld [vmem:[%s180_s1 + $0x50] sm:$0xff] }
   0x4   :  { %45 = vmatpush.msra.mxu0 %v30_v1  ;;  %v34_v9 = vld [vmem:[%s181_s2] sm:$0xff]  ;;  %v25_v11 = vld [vmem:[%s180_s1 + $0x48] sm:$0xff]  ;;  %v23_v13 = vld [vmem:[%s180_s1 + $0x38] sm:$0xff] }
   0x5   :  { %37 = vperm.xlu0 %92, %v34_v9   ;;  %79 = vmatpush.msra.mxu1 %v32_v7  ;;  %v24_v12 = vld [vmem:[%s180_s1 + $0x40] sm:$0xff]  ;;  %v22_v14 = vld [vmem:[%s180_s1 + $0x30] sm:$0xff]  ;;  %v21_v15 = vld [vmem:[%s180_s1 + $0x28] sm:$0xff] }
   0x6   :  { %46 = vmatpush.msra.mxu0 %v29_v3  ;;  %90 = vmatmul.msk.f32.vlgmr.msra.gmra.mxu1 %vm40_vm0, %v15_v8  ;;  %v20_v16 = vld [vmem:[%s180_s1 + $0x20] sm:$0xff]  ;;  %v19_v17 = vld [vmem:[%s180_s1 + $0x18] sm:$0xff]  ;;  %v18_v18 = vld [vmem:[%s180_s1 + $0x10] sm:$0xff] }
   0x7   :  { %v17_v19 = vld [vmem:[%s180_s1 + $0x8] sm:$0xff]  ;;  %v16_v20 = vld [vmem:[%s180_s1] sm:$0xff] }
   0x8   :  { %47 = vmatpush.msra.mxu0 %v28_v4  ;;  %v14_v21 = vld [vmem:[%s182_s0] sm:$0xff] }
   0xa   :  { %48 = vmatpush.msra.mxu0 %v27_v5 }
   0xc   :  { %49 = vmatpush.msra.mxu0 %v26_v10 }
   0xe   :  { %50 = vmatpush.msra.mxu0 %v25_v11 }
  0x10   :  { %51 = vmatpush.msra.mxu0 %v24_v12 }
  0x12   :  { %52 = vmatpush.msra.mxu0 %v23_v13 }
  0x14   :  { %53 = vmatpush.msra.mxu0 %v22_v14 }
  0x16   :  { %54 = vmatpush.msra.mxu0 %v21_v15 }
  0x18   :  { %55 = vmatpush.msra.mxu0 %v20_v16 }
  0x1a   :  { %56 = vmatpush.msra.mxu0 %v19_v17 }
  0x1c   :  { %57 = vmatpush.msra.mxu0 %v18_v18 }
  0x1e   :  { %58 = vmatpush.msra.mxu0 %v17_v19 }
  0x20   :  { %59 = vmatpush.msra.mxu0 %v16_v20 }
  0x21   :  { %60 = vmatmul.f32.vlgmr.msra.gmra.mxu0 %v14_v21 }
  0x77   :  { %v38_v22 = vpop.permute.xlu0 %37 }
  0x83   :  { %v81_v24 = vpop.f32.mrf.mxu1 }
  0x9e   :  { %v61_v23 = vpop.f32.mrf.mxu0 }
  0x9f   :  { %v62_v25 = vadd.f32 %v61_v23, %v38_v22 }
  0xa1   :  { %v82_v26 = vadd.f32 %v81_v24, %v62_v25 }
  0xa3   :  { %v84_v27 = vmax.f32 %v82_v26, 0.0 }
  0xa5   :  { %85 = vst [vmem:[%s183_s3] sm:$0xff] %v84_v27 }

// kernel: _lambda_.9
= control target key start
LH: loop header
LB: loop body
LE: loop exit
PB: predicated region body
PF: predicated region fallthrough
CT: control target
= control target key end

     0   :  { %v260_v3 = vmov 0   ;;  %vm57_vm0 = vcmask 588800   ;;  %vm223_vm8 = vcmask 1043456   ;;  %s416_s1 = inlined_call_operand.vmem [shape: f32[72,512], index: 1, kind: input, shape index: {}]   ;;  %s417_s0 = inlined_call_operand.vmem [shape: f32[4,72], index: 0, kind: input, shape index: {}]   ;;  %s418_s2 = inlined_call_operand.vmem [shape: f32[4,1], index: 2, kind: input, shape index: {}]   ;;  %s419_s3 = inlined_call_operand.vmem [shape: f32[4,512], index: 3, kind: output, shape index: {}]  }
   0x1   :  { %v47_v0 = vld [vmem:[%s416_s1 + $0x100] sm:$0xff]  ;;  %v48_v1 = vld [vmem:[%s416_s1 + $0x108] sm:$0xff]  ;;  %v49_v2 = vld [vmem:[%s416_s1 + $0x110] sm:$0xff]  ;;  %243 = vset.pattern.permute.xlu0 %v260_v3 }
   0x2   :  { %68 = vmatpush.msra.mxu0 %v47_v0  ;;  %88 = vmatpush.msra.mxu1 %v48_v1  ;;  %v50_v4 = vld [vmem:[%s416_s1 + $0x118] sm:$0xff]  ;;  %v43_v5 = vld [vmem:[%s416_s1 + $0xe0] sm:$0xff]  ;;  %v44_v6 = vld [vmem:[%s416_s1 + $0xe8] sm:$0xff] }
   0x3   :  { %108 = vmatpush.msra.mxu2 %v49_v2  ;;  %128 = vmatpush.msra.mxu3 %v50_v4  ;;  %v45_v7 = vld [vmem:[%s416_s1 + $0xf0] sm:$0xff]  ;;  %v46_v8 = vld [vmem:[%s416_s1 + $0xf8] sm:$0xff]  ;;  %v39_v9 = vld [vmem:[%s416_s1 + $0xc0] sm:$0xff] }
   0x4   :  { %69 = vmatpush.msra.mxu0 %v43_v5  ;;  %89 = vmatpush.msra.mxu1 %v44_v6  ;;  %v40_v10 = vld [vmem:[%s416_s1 + $0xc8] sm:$0xff]  ;;  %v41_v11 = vld [vmem:[%s416_s1 + $0xd0] sm:$0xff]  ;;  %v42_v12 = vld [vmem:[%s416_s1 + $0xd8] sm:$0xff] }
   0x5   :  { %109 = vmatpush.msra.mxu2 %v45_v7  ;;  %129 = vmatpush.msra.mxu3 %v46_v8  ;;  %v35_v13 = vld [vmem:[%s416_s1 + $0xa0] sm:$0xff]  ;;  %v36_v14 = vld [vmem:[%s416_s1 + $0xa8] sm:$0xff]  ;;  %v37_v15 = vld [vmem:[%s416_s1 + $0xb0] sm:$0xff] }
   0x6   :  { %70 = vmatpush.msra.mxu0 %v39_v9  ;;  %90 = vmatpush.msra.mxu1 %v40_v10  ;;  %v38_v16 = vld [vmem:[%s416_s1 + $0xb8] sm:$0xff]  ;;  %v31_v17 = vld [vmem:[%s416_s1 + $0x80] sm:$0xff]  ;;  %v32_v18 = vld [vmem:[%s416_s1 + $0x88] sm:$0xff] }
   0x7   :  { %110 = vmatpush.msra.mxu2 %v41_v11  ;;  %130 = vmatpush.msra.mxu3 %v42_v12  ;;  %v33_v19 = vld [vmem:[%s416_s1 + $0x90] sm:$0xff]  ;;  %v34_v20 = vld [vmem:[%s416_s1 + $0x98] sm:$0xff]  ;;  %v27_v21 = vld [vmem:[%s416_s1 + $0x60] sm:$0xff] }
   0x8   :  { %71 = vmatpush.msra.mxu0 %v35_v13  ;;  %91 = vmatpush.msra.mxu1 %v36_v14  ;;  %v28_v22 = vld [vmem:[%s416_s1 + $0x68] sm:$0xff]  ;;  %v29_v23 = vld [vmem:[%s416_s1 + $0x70] sm:$0xff]  ;;  %v30_v24 = vld [vmem:[%s416_s1 + $0x78] sm:$0xff] }
   0x9   :  { %111 = vmatpush.msra.mxu2 %v37_v15  ;;  %131 = vmatpush.msra.mxu3 %v38_v16  ;;  %v23_v25 = vld [vmem:[%s416_s1 + $0x40] sm:$0xff]  ;;  %v24_v26 = vld [vmem:[%s416_s1 + $0x48] sm:$0xff]  ;;  %v25_v27 = vld [vmem:[%s416_s1 + $0x50] sm:$0xff] }
   0xa   :  { %72 = vmatpush.msra.mxu0 %v31_v17  ;;  %92 = vmatpush.msra.mxu1 %v32_v18  ;;  %v26_v28 = vld [vmem:[%s416_s1 + $0x58] sm:$0xff]  ;;  %v19_v29 = vld [vmem:[%s416_s1 + $0x20] sm:$0xff]  ;;  %v20_v30 = vld [vmem:[%s416_s1 + $0x28] sm:$0xff] }
   0xb   :  { %112 = vmatpush.msra.mxu2 %v33_v19  ;;  %132 = vmatpush.msra.mxu3 %v34_v20  ;;  %v21_v31 = vld [vmem:[%s416_s1 + $0x30] sm:$0xff]  ;;  %v22_v32 = vld [vmem:[%s416_s1 + $0x38] sm:$0xff]  ;;  %v15_v33 = vld [vmem:[%s416_s1] sm:$0xff] }
   0xc   :  { %73 = vmatpush.msra.mxu0 %v27_v21  ;;  %93 = vmatpush.msra.mxu1 %v28_v22  ;;  %v16_v34 = vld [vmem:[%s416_s1 + $0x8] sm:$0xff]  ;;  %v17_v35 = vld [vmem:[%s416_s1 + $0x10] sm:$0xff]  ;;  %v18_v36 = vld [vmem:[%s416_s1 + $0x18] sm:$0xff] }
   0xd   :  { %113 = vmatpush.msra.mxu2 %v29_v23  ;;  %133 = vmatpush.msra.mxu3 %v30_v24  ;;  %v14_v37 = vld [vmem:[%s417_s0] sm:$0xf] }
   0xe   :  { %74 = vmatpush.msra.mxu0 %v23_v25  ;;  %94 = vmatpush.msra.mxu1 %v24_v26  ;;  %v51_v38 = vld [vmem:[%s418_s2] sm:$0xf] }
   0xf   :  { %114 = vmatpush.msra.mxu2 %v25_v27  ;;  %134 = vmatpush.msra.mxu3 %v26_v28 }
  0x10   :  { %75 = vmatpush.msra.mxu0 %v19_v29  ;;  %95 = vmatpush.msra.mxu1 %v20_v30 }
  0x11   :  { %115 = vmatpush.msra.mxu2 %v21_v31  ;;  %135 = vmatpush.msra.mxu3 %v22_v32 }
  0x12   :  { %76 = vmatpush.msra.mxu0 %v15_v33  ;;  %96 = vmatpush.msra.mxu1 %v16_v34 }
  0x13   :  { %116 = vmatpush.msra.mxu2 %v17_v35  ;;  %136 = vmatpush.msra.mxu3 %v18_v36 }
  0x14   :  { %234 = vmatmul.msk.f32.vlgmr.msra.gmra.mxu0 %vm57_vm0, %v14_v37  ;;  %235 = vmatmul.msk.f32.vlgmr.msra.gmra.mxu1 %vm57_vm0, %v14_v37 }
  0x15   :  { %236 = vmatmul.msk.f32.vlgmr.msra.gmra.mxu2 %vm57_vm0, %v14_v37  ;;  %237 = vmatmul.msk.f32.vlgmr.msra.gmra.mxu3 %vm57_vm0, %v14_v37 }
  0x16   :  { %54 = vperm.xlu0 %243, %v51_v38  }
  0x88   :  { %v55_v39 = vpop.permute.xlu0 %54 }
  0x91   :  { %v78_v40 = vpop.f32.mrf.mxu0  ;;  %v98_v41 = vpop.f32.mrf.mxu1 }
  0x92   :  { %v79_v42 = vadd.f32 %v78_v40, %v55_v39  ;;  %v99_v43 = vadd.f32 %v98_v41, %v55_v39 }
  0x94   :  { %v238_v44 = vmul.f32 -1.442695, %v79_v42  ;;  %v239_v45 = vmul.f32 -1.442695, %v99_v43 }
  0x96   :  { %244 = vpow2.f32 %v238_v44 }
  0x97   :  { %246 = vpow2.f32 %v239_v45 }
  0x98   :  { %v118_v46 = vpop.f32.mrf.mxu2  ;;  %v138_v47 = vpop.f32.mrf.mxu3 }
  0x99   :  { %v119_v48 = vadd.f32 %v118_v46, %v55_v39  ;;  %v139_v49 = vadd.f32 %v138_v47, %v55_v39 }
  0x9b   :  { %v240_v50 = vmul.f32 -1.442695, %v119_v48  ;;  %v241_v51 = vmul.f32 -1.442695, %v139_v49 }
  0x9c   :  { %v245_v52 = vpop.eup %244 }
  0x9d   :  { %v247_v53 = vpop.eup %246  ;;  %v153_v54 = vadd.f32 1.0, %v245_v52  ;;  %248 = vpow2.f32 %v240_v50 }
  0x9e   :  { %v154_v55 = vadd.f32 1.0, %v247_v53  ;;  %250 = vpow2.f32 %v241_v51 }
  0x9f   :  { %252 = vrcp.f32 %v153_v54  ;;  %vm162_vm1 = vweird.f32 %v153_v54  ;;  %v168_v8 = vand.u32 2147483648, %v153_v54  ;;  %v166_v10 = vand.u32 2147483647, %v153_v54 }
  0xa0   :  { %254 = vrcp.f32 %v154_v55  ;;  %v181_v3 = vand.u32 2147483647, %v154_v55  ;;  %v183_v4 = vand.u32 2147483648, %v154_v55  ;;  %vm177_vm3 = vweird.f32 %v154_v55 }
  0xa1   :  { %v169_v19 = vor.u32 1.1754944e-38, %v168_v8  ;;  %vm167_vm9 = vcmp.eq.f32.partialorder %v166_v10, 8.507059e+37 }
  0xa2   :  { %vm182_vm7 = vcmp.eq.f32.partialorder %v181_v3, 8.507059e+37  ;;  %v184_v14 = vor.u32 1.1754944e-38, %v183_v4 }
  0xa3   :  { %v249_v56 = vpop.eup %248 }
  0xa4   :  { %v251_v57 = vpop.eup %250  ;;  %v395_v58 = vadd.f32 1.0, %v249_v56 }
  0xa5   :  { %v253_v59 = vpop.eup %252  ;;  %v156_v60 = vadd.f32 1.0, %v251_v57 }
  0xa6   :  { %v255_v61 = vpop.eup %254  ;;  %v158_v62 = vmul.f32 %v253_v59, %v153_v54  ;;  %256 = vrcp.f32 %v395_v58  ;;  %vm163_vm2 = vweird.f32 %v253_v59  ;;  %vm192_vm12 = vweird.f32 %v395_v58 }
  0xa7   :  { %v173_v63 = vmul.f32 %v255_v61, %v154_v55  ;;  %258 = vrcp.f32 %v156_v60  ;;  %vm178_vm4 = vweird.f32 %v255_v61  ;;  %vm398_vm5 = vmor %vm162_vm1, %vm163_vm2  ;;  %v211_v25 = vand.u32 2147483647, %v156_v60 }
  0xa8   :  { %v159_v0 = vsub.f32 1.0, %v158_v62  ;;  %vm179_vm6 = vmor %vm177_vm3, %vm178_vm4  ;;  %v213_v26 = vand.u32 2147483648, %v156_v60  ;;  %v198_v30 = vand.u32 2147483648, %v395_v58  ;;  %v196_v31 = vand.u32 2147483647, %v395_v58 }
  0xa9   :  { %v174_v1 = vsub.f32 1.0, %v173_v63  ;;  %vm207_vm14 = vweird.f32 %v156_v60  ;;  %vm212_vm0 = vcmp.eq.f32.partialorder %v211_v25, 8.507059e+37 }
  0xaa   :  { %v160_v2 = vmul.f32 %v253_v59, %v159_v0  ;;  %v214_v33 = vor.u32 1.1754944e-38, %v213_v26  ;;  %v199_v36 = vor.u32 1.1754944e-38, %v198_v30  ;;  %vm197_vm1 = vcmp.eq.f32.partialorder %v196_v31, 8.507059e+37 }
  0xab   :  { %v175_v5 = vmul.f32 %v255_v61, %v174_v1 }
  0xac   :  { %v257_v6 = vpop.eup %256  ;;  %v161_v7 = vadd.f32 %v253_v59, %v160_v2 }
  0xad   :  { %v176_v11 = vadd.f32 %v255_v61, %v175_v5  ;;  %v188_v12 = vmul.f32 %v257_v6, %v395_v58  ;;  %v259_v13 = vpop.eup %258  ;;  %vm193_vm10 = vweird.f32 %v257_v6 }
  0xae   :  { %v165_v15 = vsel %vm398_vm5, %v253_v59, %v161_v7  ;;  %v203_v18 = vmul.f32 %v259_v13, %v156_v60  ;;  %vm208_vm11 = vweird.f32 %v259_v13  ;;  %vm194_vm13 = vmor %vm192_vm12, %vm193_vm10 }
  0xaf   :  { %v180_v16 = vsel %vm179_vm6, %v255_v61, %v176_v11  ;;  %v189_v17 = vsub.f32 1.0, %v188_v12  ;;  %v170_v24 = vsel %vm167_vm9, %v169_v19, %v165_v15  ;;  %vm209_vm15 = vmor %vm207_vm14, %vm208_vm11 }
  0xb0   :  { %v185_v20 = vsel %vm182_vm7, %v184_v14, %v180_v16  ;;  %v204_v23 = vsub.f32 1.0, %v203_v18 }
  0xb1   :  { %v221_v21 = vrot.slane %v185_v20, 4  ;;  %v190_v22 = vmul.f32 %v257_v6, %v189_v17 }
  0xb2   :  { %v205_v29 = vmul.f32 %v259_v13, %v204_v23 }
  0xb3   :  { %v224_v27 = vsel %vm223_vm8, %v170_v24, %v221_v21  ;;  %v191_v28 = vadd.f32 %v257_v6, %v190_v22 }
  0xb4   :  { %228 = vst [vmem:[%s419_s3] sm:$0xff] %v224_v27  ;;  %v206_v32 = vadd.f32 %v259_v13, %v205_v29 }
  0xb5   :  { %v195_v34 = vsel %vm194_vm13, %v257_v6, %v191_v28 }
  0xb6   :  { %v210_v35 = vsel %vm209_vm15, %v259_v13, %v206_v32  ;;  %v200_v39 = vsel %vm197_vm1, %v199_v36, %v195_v34 }
  0xb7   :  { %v215_v37 = vsel %vm212_vm0, %v214_v33, %v210_v35 }
  0xb8   :  { %v222_v38 = vrot.slane %v215_v37, 4 }
  0xba   :  { %v225_v40 = vsel %vm223_vm8, %v200_v39, %v222_v38 }
  0xbb   :  { %229 = vst [vmem:[%s419_s3 + $0x8] sm:$0xff] %v225_v40 }

</bundles_post_ra>
